<compile_context>
chip_gen: v7x
topology: tpu7x:2x2x1
jax: 0.10.0
libtpu: 0.0.40
codegen_flags: <defaults>
</compile_context>

<pallas_src>
import jax
import jax.numpy as jnp
from jax.experimental import pallas as pl
from jax.experimental.pallas import tpu as pltpu

TAPS = 4  # 2x2 deconv kernel -> 4 output sub-pixels per input pixel


# ----------------------------- Pallas kernels -----------------------------

def _plain_kernel(x_ref, w_ref, o_ref):
    # deconv-as-matmul, bias folded into the last row of w (ones column in x)
    o_ref[...] = jnp.dot(x_ref[...], w_ref[...],
                         preferred_element_type=jnp.float32).astype(o_ref.dtype)


def _make_norm_kernel(eps):
    def kernel(x_ref, w_ref, g_ref, b_ref, p_ref, o_ref):
        # fused deconv-as-matmul (+bias via ones column), lane-dense (tile, 4*Cout)
        y = jnp.dot(x_ref[...], w_ref[...], preferred_element_type=jnp.float32)
        # grouped LayerNorm (one per output pixel / tap chunk of width Cout).
        # P is a precomputed block-diagonal 1/Cout projector, so both statistic
        # matmuls are lane-dense N=384 and independent of each other.
        p = p_ref[...]
        mu = jnp.dot(y, p, preferred_element_type=jnp.float32)
        m2 = jnp.dot(y * y, p, preferred_element_type=jnp.float32)
        var = jnp.maximum(m2 - mu * mu, 0.0)
        o_ref[...] = ((y - mu) * jax.lax.rsqrt(var + eps) * g_ref[...]
                      + b_ref[...]).astype(o_ref.dtype)
    return kernel


# ----------------------------- tiling helper -----------------------------

def _choose_tiling(m, max_tile):
    """Pick a row tile (<= max_tile) and padded row count.

    Prefers large tiles (per-step overhead amortization, ~85%+ of HBM roofline at
    512/1024) while keeping >=4 grid steps for big M (v7x megacore sharding +
    per-core pipelining).  M is padded to a tile multiple -> no monolithic
    single-block fallback, no VMEM blowups for odd M.
    """
    tile = 256
    for t in (1024, 512):
        if t <= max_tile and m >= 4 * t:
            tile = t
            break
    m_pad = -(-m // tile) * tile
    return m_pad, tile


# ----------------------------- wrapper -----------------------------

def patch_unembed(x_nchw, weight, bias, gamma=None, beta=None, eps=1e-5):
    """PatchUnEmbed forward.

    x_nchw : (B, Cin, H, W)            input, NCHW like PyTorch
    weight : (Cin, Cout, 2, 2)         torch ConvTranspose2d weight layout
    bias   : (Cout,)
    gamma/beta : (Cout,) or None       optional LayerNorm affine (norm_layer)
    returns: (B, Cout, 2H, 2W)         NCHW, matching the PyTorch module
    """
    B, Cin, H, W = x_nchw.shape
    Cout = weight.shape[1]
    use_norm = gamma is not None
    out_dtype = x_nchw.dtype
    N = TAPS * Cout

    # rows = input pixels, channels-last; append a ones column so the bias rides
    # in the matmul (K: Cin -> Cin+1, still far under the MXU's padded K).
    M = B * H * W
    x_rows = jnp.transpose(x_nchw, (0, 2, 3, 1)).reshape(M, Cin)
    x_rows = jnp.concatenate([x_rows, jnp.ones((M, 1), x_rows.dtype)], axis=-1)
    Kdim = Cin + 1

    # pack the 4 deconv taps along lanes: Wflat[:, t*Cout + c] = W[:, c, kh, kw],
    # t = kh*2 + kw; append the (tap-tiled) bias as the last row.
    w_flat = jnp.transpose(weight, (0, 2, 3, 1)).reshape(Cin, N)
    b_row = jnp.tile(bias.reshape(1, Cout), (1, TAPS))
    w_aug = jnp.concatenate([w_flat, b_row], axis=0).astype(x_rows.dtype)

    max_tile = 512 if use_norm else 1024  # norm path keeps v5e's 16 MiB scoped VMEM safe
    m_pad, tile = _choose_tiling(M, max_tile)
    if m_pad != M:
        x_rows = jnp.pad(x_rows, ((0, m_pad - M), (0, 0)))
    grid = (m_pad // tile,)

    in_specs = [
        pl.BlockSpec((tile, Kdim), lambda i: (i, 0)),
        pl.BlockSpec((Kdim, N), lambda i: (0, 0)),
    ]
    args = [x_rows, w_aug]

    if use_norm:
        g_flat = jnp.tile(gamma.reshape(1, Cout), (1, TAPS)).astype(jnp.float32)
        be_flat = jnp.tile(beta.reshape(1, Cout), (1, TAPS)).astype(jnp.float32)
        # precomputed block-diagonal mean projector P = avg @ spread (1/Cout blocks)
        gid = jnp.arange(N) // Cout
        proj = (gid[:, None] == gid[None, :]).astype(jnp.float32) / Cout  # (N, N)
        in_specs += [
            pl.BlockSpec((1, N), lambda i: (0, 0)),
            pl.BlockSpec((1, N), lambda i: (0, 0)),
            pl.BlockSpec((N, N), lambda i: (0, 0)),
        ]
        args += [g_flat, be_flat, proj]
        kernel = _make_norm_kernel(eps)
    else:
        kernel = _plain_kernel

    y = pl.pallas_call(
        kernel,
        out_shape=jax.ShapeDtypeStruct((m_pad, N), out_dtype),
        grid=grid,
        in_specs=in_specs,
        out_specs=pl.BlockSpec((tile, N), lambda i: (i, 0)),
        compiler_params=pltpu.CompilerParams(
            dimension_semantics=("parallel",)),
    )(*args)

    if m_pad != M:
        y = y[:M]

    # Epilogue layout glue, ONE fused transpose:
    # (M, 4*Cout) -> (b,h,w,kh,kw,c) -> (b,c,h,kh,w,kw) -> (B, Cout, 2H, 2W)
    y = y.reshape(B, H, W, 2, 2, Cout)
    y = jnp.transpose(y, (0, 5, 1, 3, 2, 4)).reshape(B, Cout, 2 * H, 2 * W)
    return y


# ----------------------------- pure-JAX reference -----------------------------

def patch_unembed_ref(x, w, b, gamma=None, beta=None, eps=1e-5):
    B, Cin, H, W = x.shape
    Cout = w.shape[1]
    out = jnp.zeros((B, Cout, 2 * H, 2 * W), jnp.float32)
    for kh in range(2):
        for kw in range(2):
            contrib = jnp.einsum('bihw,io->bohw', x, w[:, :, kh, kw])
            out = out.at[:, :, kh::2, kw::2].set(contrib)
    out = out + b[None, :, None, None]
    if gamma is not None:
        t = jnp.transpose(out, (0, 2, 3, 1))
        mu = jnp.mean(t, axis=-1, keepdims=True)
        var = jnp.mean((t - mu) ** 2, axis=-1, keepdims=True)
        t = (t - mu) / jnp.sqrt(var + eps) * gamma + beta
        out = jnp.transpose(t, (0, 3, 1, 2))
    return out


# ----------------------------------- main -----------------------------------

if __name__ == "__main__":
    # module defaults: in_chans=3, embed_dim=96 ; small spatial shape
    B, Cin, H, W = 2, 3, 16, 16
    Cout = 96

    key = jax.random.PRNGKey(0)
    kx, kw, kb, kg, kbe = jax.random.split(key, 5)
    x = jax.random.normal(kx, (B, Cin, H, W), jnp.float32)
    w = 0.1 * jax.random.normal(kw, (Cin, Cout, 2, 2), jnp.float32)
    b = 0.1 * jax.random.normal(kb, (Cout,), jnp.float32)
    gamma = 1.0 + 0.1 * jax.random.normal(kg, (Cout,), jnp.float32)
    beta = 0.1 * jax.random.normal(kbe, (Cout,), jnp.float32)

    # norm_layer=None path (module default)
    out_plain = jax.block_until_ready(patch_unembed(x, w, b))
    # norm_layer=nn.LayerNorm path
    out_norm = jax.block_until_ready(patch_unembed(x, w, b, gamma, beta))

    assert out_plain.shape == (B, Cout, 2 * H, 2 * W)
    assert out_norm.shape == (B, Cout, 2 * H, 2 * W)

    ref_plain = patch_unembed_ref(x, w, b)
    ref_norm = patch_unembed_ref(x, w, b, gamma, beta)
    assert jnp.allclose(out_plain, ref_plain, atol=1e-4, rtol=1e-4)
    assert jnp.allclose(out_norm, ref_norm, atol=1e-4, rtol=1e-4)
    assert bool(jnp.all(jnp.isfinite(out_norm)))

    print("KERNEL_OK")
</pallas_src>

<mosaic_0001>
module attributes {stable_mosaic.version = 11 : i64} {
  func.func @_plain_kernel(%arg0: i32, %arg1: memref<256x4xf32, #tpu.memory_space<vmem>>, %arg2: memref<4x384xf32, #tpu.memory_space<vmem>>, %arg3: memref<256x384xf32, #tpu.memory_space<vmem>>) attributes {dimension_semantics = [#tpu.dimension_semantics<parallel>], iteration_bounds = array<i64: 2>, scalar_prefetch = 0 : i64, scratch_operands = 0 : i64, tpu.core_type = #tpu.core_type<tc>, window_params = [{transform_indices = @transform_0, window_bounds = array<i64: 256, 4>}, {pipeline_mode = #tpu.pipeline_mode<synchronous>, transform_indices = @transform_1, window_bounds = array<i64: 4, 384>}, {transform_indices = @transform_2, window_bounds = array<i64: 256, 384>}]} {
    %c0 = arith.constant 0 : index
    %c0_0 = arith.constant 0 : index
    %0 = vector.load %arg1[%c0, %c0_0] : memref<256x4xf32, #tpu.memory_space<vmem>>, vector<256x4xf32>
    %c0_1 = arith.constant 0 : index
    %c0_2 = arith.constant 0 : index
    %1 = vector.load %arg2[%c0_1, %c0_2] : memref<4x384xf32, #tpu.memory_space<vmem>>, vector<4x384xf32>
    %cst = arith.constant dense<0.000000e+00> : vector<256x384xf32>
    %2 = tpu.matmul %0, %1, %cst {dimension_numbers = #tpu.dot_dimension_numbers<[1], [0], [0], [1], [0, 0, 1, 1], [], []>} : vector<256x4xf32>, vector<4x384xf32>, vector<256x384xf32> -> vector<256x384xf32>
    %c0_3 = arith.constant 0 : index
    %c0_4 = arith.constant 0 : index
    %3 = vector.load %arg3[%c0_3, %c0_4] : memref<256x384xf32, #tpu.memory_space<vmem>>, vector<256x384xf32>
    tpu.vector_store %arg3[%c0_3, %c0_4], %2 {strides = array<i32>} : memref<256x384xf32, #tpu.memory_space<vmem>>, vector<256x384xf32>,
    return
  }
  func.func @transform_0(%arg0: i32) -> (i32, i32) {
    %c0_i32 = arith.constant 0 : i32
    %c0_i32_0 = arith.constant 0 : i32
    return %arg0, %c0_i32 : i32, i32
  }
  func.func @transform_1(%arg0: i32) -> (i32, i32) {
    %c0_i32 = arith.constant 0 : i32
    %c0_i32_0 = arith.constant 0 : i32
    %c0_i32_1 = arith.constant 0 : i32
    return %c0_i32, %c0_i32_0 : i32, i32
  }
  func.func @transform_2(%arg0: i32) -> (i32, i32) {
    %c0_i32 = arith.constant 0 : i32
    %c0_i32_0 = arith.constant 0 : i32
    return %arg0, %c0_i32 : i32, i32
  }
}

</mosaic_0001>

<bundles_post_ra>
// kernel: tpu_custom_call.1
= control target key start
LH: loop header
LB: loop body
LE: loop exit
PB: predicated region body
PF: predicated region fallthrough
CT: control target
= control target key end

     0   :  { %7 = vsyncpa [#allocation3], 0  ;;  %s1611_s0 = inlined_call_operand.vmem [shape: f32[512,4], index: 0, kind: input, shape index: {}]   ;;  %s1612_s1 = inlined_call_operand.vmem [shape: f32[4,384], index: 1, kind: input, shape index: {}]   ;;  %s1613_s2 = inlined_call_operand.hbm [shape: f32[512,384], index: 2, kind: output, shape index: {}]  }
   0x1   :  { %9 = vsyncpa [#allocation3 + $0x1], 0  ;;  %s1232_s9 = smov 0   ;;  %s1234_s10 = smov 0  }
   0x2   :  { %s1236_s11 = smov 0   ;;  %s1238_s12 = smov 0  }
   0x3 LB: > { %s1253_s13 = sadd.s32 4294967295, %s1211_s12   ;;  %s941_s14 = sadd.s32 4294967294, %s1211_s12   ;;  %s1211_s12 = sphi %s1238_s12, %s1619_s12   ;;  %s1207_s11 = sphi %s1236_s11, %s1618_s11   ;;  %s1203_s10 = sphi %s1234_s10, %s1617_s10   ;;  %s1199_s9 = sphi %s1232_s9, %s1616_s9  }
   0x4   : > { %s1257_s15 = sadd.s32 1, %s1211_s12   ;;  %s69_s16 = sadd.s32 1, %s1207_s11 }
   0x5   : > { %s66_s17 = ssub.s32 %s1211_s12, %s1257_s15  ;;  %p79_p0 = scmp.ne.s32.totalorder %s1207_s11, %s1203_s10 }
   0x6   : > { %p67_p1 = scmp.eq.s32.totalorder %s66_s17, 0  ;;  %p80_p2 = scmp.eq.s32.totalorder %s1253_s13, 1 }
   0x7   : > { %p85_p3 = scmp.ne.s32.totalorder %s1203_s10, %s1199_s9  ;;  %p86_p4 = scmp.eq.s32.totalorder %s941_s14, 1 }
   0x8   : > { %s1268_s18 = scalar_select %p67_p1, %s1207_s11, %s69_s16  }
   0x9   : > { %p1270_p5 = por %p80_p2, %p79_p0  ;;  %p1274_p6 = por %p86_p4, %p85_p3 }
   0xa   : > { %p944_p7 = scmp.ge.s32.totalorder %s1211_s12, 1  ;;  %p116_p8 = scmp.lt.s32.totalorder %s1211_s12, 3 }
   0xc   : > { %p117_p9 = pnand %p944_p7, %p116_p8 }
   0xd   : > { %v177_v0 = vld [vmem:[%s1612_s1] sm:$0xff] (!%p117_p9)  ;;  %vm279_vm0 = vcmask (!%p117_p9), 1043456   ;;  %s945_s23 = sshll.u32 (!%p117_p9), %s1253_s13, 5  ;;  %v1213_v2 = vmov (!%p117_p9), 0.0   ;;  %v178_v3 = vld [vmem:[%s1612_s1 + $0x8] sm:$0xf] (!%p117_p9) }
   0xe   : > { %120 = sbr.rel (%p117_p9) target bundleno = 346 (0x15a), region = 28  ;;  %v181_v1 = vcombine.high (!%p117_p9), %v177_v0, %v177_v0  ;;  %350 = vmatprep.mubr.f32.mxu0 (!%p117_p9), %v1213_v2  ;;  %494 = vmatprep.mubr.f32.mxu1 (!%p117_p9), %v1213_v2  ;;  %p139_p10 = scmp.lt.s32.totalorder (!%p117_p9), %s945_s23, 63  ;;  %vm182_vm1 = vcmask (!%p117_p9), 31744  }
   0xf   : > { %s135_s30 = sand.u32 (!%p117_p9), 1, %s1203_s10   ;;  %s1105_s5 = smul.u32 (!%p117_p9), 12288, %s1253_s13 }
  0x10   : > { %1102 = vmatprep.subr.msk.mxu1 (!%p117_p9), %vm279_vm0, %v181_v1  ;;  %947 = vmatprep.subr.msk.mxu0 (!%p117_p9), %vm279_vm0, %v181_v1  ;;  %s1104_s3 = smul.u32 (!%p117_p9), 768, %s135_s30  ;;  %s1570_s13 = scalar_lea.sflag (!%p117_p9), [#allocation3], %s135_s30 }
  0x11   : > { %1103 = vmatpush1.msk.msra.mxu1 (!%p117_p9), %vm279_vm0, %v177_v0  ;;  %948 = vmatpush1.msk.msra.mxu0 (!%p117_p9), %vm279_vm0, %v177_v0  ;;  %s1560_s14 = scalar_lea.hbm (!%p117_p9), %s1613_s2, %s1105_s5  ;;  %s1214_s17 = smov (!%p117_p9), [#allocation2]  }
  0x12   : > { %1052 = vmatprep.subr.msk.mxu1 (!%p117_p9), %vm279_vm0, %v178_v3  ;;  %s1461_s4 = scalar_lea.vmem (!%p117_p9), [#allocation2], %s1104_s3  ;;  %s1153_s21 = sshll.u32 (!%p117_p9), %s1214_s17, 4  ;;  %s1154_s21 = int_to_ptr.vmem [resolvable:$false] %s1153_s21 }
  0x13   : > { %s879_s6 = sshll.u32 (!%p117_p9), %s1461_s4, 4  ;;  %s1155_s22 = scalar_lea.vmem (!%p117_p9), %s1154_s21, 24576  ;;  %s1562_s6 = int_to_ptr.vmem [resolvable:$true] %s879_s6 }
  0x14   : > { %s1149_s16 = scalar_lea.vmem (!%p117_p9), %s1562_s6, 12288  ;;  %p1156_p0 = scmp.lt.s32.totalorder (!%p117_p9), %s1562_s6, %s1154_s21 }
  0x15   : > { %s1621_s23 = smov (!%p139_p10, %s945_s23), 63  ;;  %p1150_p11 = scmp.ne.s32.totalorder %s1562_s6, %s1149_s16 }
  0x16   : > { %s946_s26 = sshll.u32 %s1621_s23, 3  ;;  %p1157_p1 = scmp.lt.s32.totalorder %s1155_s22, %s1149_s16 }
  0x17   : > { %s1297_s29 = scalar_lea.vmem %s1611_s0, %s946_s26  ;;  %p1151_p12 = pnand %p1150_p11, %p1270_p5 }
  0x18   : > { %v145_v4 = vld [vmem:[%s1297_s29] sm:$0xff]  ;;  %v146_v6 = vld [vmem:[%s1297_s29 + $0x8] sm:$0xff]  ;;  %v147_v8 = vld [vmem:[%s1297_s29 + $0x10] sm:$0xff]  ;;  %p1158_p2 = por %p1157_p1, %p1156_p0 }
  0x19   : > { %v1301_v5 = vld [vmem:[%s1297_s29 + $0xc0] sm:$0xff]  ;;  %949 = vmatmul.mubr.msk.f32.vlgmr.msra.gmra.mrb[0].mxu0 %vm182_vm1, %v145_v4  ;;  %v1310_v7 = vld [vmem:[%s1297_s29 + $0xc8] sm:$0xff]  ;;  %v1320_v9 = vld [vmem:[%s1297_s29 + $0xd0] sm:$0xff]  ;;  %p1152_p13 = pneg %p1151_p12 }
  0x1a   : > { %973 = vmatmul.mubr.msk.f32.vlgmr.msra.gmra.mrb[0].mxu1 %vm182_vm1, %v1301_v5  ;;  %356 = vmatprep.mubr.f32.mxu0 %v1213_v2  ;;  %v148_v10 = vld [vmem:[%s1297_s29 + $0x18] sm:$0xff]  ;;  %v149_v12 = vld [vmem:[%s1297_s29 + $0x20] sm:$0xff]  ;;  %v150_v14 = vld [vmem:[%s1297_s29 + $0x28] sm:$0xff] }
  0x1b   : > { %1053 = vmatpush3.msk.msra.mxu1 %vm279_vm0, %v178_v3  ;;  %500 = vmatprep.mubr.f32.mxu1 %v1213_v2  ;;  %v1329_v11 = vld [vmem:[%s1297_s29 + $0xd8] sm:$0xff]  ;;  %v1338_v13 = vld [vmem:[%s1297_s29 + $0xe0] sm:$0xff]  ;;  %v1347_v15 = vld [vmem:[%s1297_s29 + $0xe8] sm:$0xff]  ;;  %p1159_p3 = pnand %p1158_p2, %p1152_p13 }
  0x1c   : > { %v151_v16 = vld [vmem:[%s1297_s29 + $0x30] sm:$0xff]  ;;  %v152_v18 = vld [vmem:[%s1297_s29 + $0x38] sm:$0xff]  ;;  %v153_v20 = vld [vmem:[%s1297_s29 + $0x40] sm:$0xff] }
  0x1d   : > { %950 = vmatmul.mubr.msk.f32.gmra.mrb[2].mxu0 %vm182_vm1, %v146_v6  ;;  %v1356_v17 = vld [vmem:[%s1297_s29 + $0xf0] sm:$0xff]  ;;  %v1365_v19 = vld [vmem:[%s1297_s29 + $0xf8] sm:$0xff]  ;;  %v154_v21 = vld [vmem:[%s1297_s29 + $0x48] sm:$0xff] }
  0x1e   : > { %974 = vmatmul.mubr.msk.f32.gmra.mrb[2].mxu1 %vm182_vm1, %v1310_v7  ;;  %362 = vmatprep.mubr.f32.mxu0 %v1213_v2  ;;  %v155_v22 = vld [vmem:[%s1297_s29 + $0x50] sm:$0xff]  ;;  %v156_v23 = vld [vmem:[%s1297_s29 + $0x58] sm:$0xff]  ;;  %v157_v24 = vld [vmem:[%s1297_s29 + $0x60] sm:$0xff] }
  0x1f   : > { %506 = vmatprep.mubr.f32.mxu1 %v1213_v2  ;;  %v158_v25 = vld [vmem:[%s1297_s29 + $0x68] sm:$0xff]  ;;  %v159_v26 = vld [vmem:[%s1297_s29 + $0x70] sm:$0xff]  ;;  %v160_v27 = vld [vmem:[%s1297_s29 + $0x78] sm:$0xff] }
  0x20   : > { %v161_v28 = vld [vmem:[%s1297_s29 + $0x80] sm:$0xff]  ;;  %v162_v29 = vld [vmem:[%s1297_s29 + $0x88] sm:$0xff]  ;;  %v163_v30 = vld [vmem:[%s1297_s29 + $0x90] sm:$0xff] }
  0x21   : > { %951 = vmatmul.mubr.msk.f32.gmra.mrb[4].mxu0 %vm182_vm1, %v147_v8  ;;  %v164_v31 = vld [vmem:[%s1297_s29 + $0x98] sm:$0xff]  ;;  %v165_v32 = vld [vmem:[%s1297_s29 + $0xa0] sm:$0xff]  ;;  %v166_v33 = vld [vmem:[%s1297_s29 + $0xa8] sm:$0xff] }
  0x22   : > { %975 = vmatmul.mubr.msk.f32.gmra.mrb[4].mxu1 %vm182_vm1, %v1320_v9  ;;  %368 = vmatprep.mubr.f32.mxu0 %v1213_v2  ;;  %v167_v34 = vld [vmem:[%s1297_s29 + $0xb0] sm:$0xff]  ;;  %v168_v35 = vld [vmem:[%s1297_s29 + $0xb8] sm:$0xff] }
  0x23   : > { %512 = vmatprep.mubr.f32.mxu1 %v1213_v2 }
  0x25   : > { %952 = vmatmul.mubr.msk.f32.gmra.mrb[6].mxu0 %vm182_vm1, %v148_v10 }
  0x26   : > { %976 = vmatmul.mubr.msk.f32.gmra.mrb[6].mxu1 %vm182_vm1, %v1329_v11  ;;  %374 = vmatprep.mubr.f32.mxu0 %v1213_v2 }
  0x27   : > { %518 = vmatprep.mubr.f32.mxu1 %v1213_v2 }
  0x29   : > { %953 = vmatmul.mubr.msk.f32.gmra.mrb[8].mxu0 %vm182_vm1, %v149_v12 }
  0x2a   : > { %977 = vmatmul.mubr.msk.f32.gmra.mrb[8].mxu1 %vm182_vm1, %v1338_v13  ;;  %380 = vmatprep.mubr.f32.mxu0 %v1213_v2 }
  0x2b   : > { %524 = vmatprep.mubr.f32.mxu1 %v1213_v2 }
  0x2d   : > { %954 = vmatmul.mubr.msk.f32.gmra.mrb[10].mxu0 %vm182_vm1, %v150_v14 }
  0x2e   : > { %978 = vmatmul.mubr.msk.f32.gmra.mrb[10].mxu1 %vm182_vm1, %v1347_v15  ;;  %386 = vmatprep.mubr.f32.mxu0 %v1213_v2 }
  0x2f   : > { %530 = vmatprep.mubr.f32.mxu1 %v1213_v2 }
  0x31   : > { %955 = vmatmul.mubr.msk.f32.gmra.mrb[12].mxu0 %vm182_vm1, %v151_v16 }
  0x32   : > { %979 = vmatmul.mubr.msk.f32.gmra.mrb[12].mxu1 %vm182_vm1, %v1356_v17  ;;  %392 = vmatprep.mubr.f32.mxu0 %v1213_v2 }
  0x33   : > { %536 = vmatprep.mubr.f32.mxu1 %v1213_v2 }
  0x35   : > { %956 = vmatmul.mubr.msk.f32.gmra.mrb[14].mxu0 %vm182_vm1, %v152_v18 }
  0x36   : > { %980 = vmatmul.mubr.msk.f32.gmra.mrb[14].mxu1 %vm182_vm1, %v1365_v19  ;;  %398 = vmatprep.mubr.f32.mxu0 %v1213_v2 }
  0x37   : > { %1054 = vmatprep.mubr.msk.f32.mxu1 %vm182_vm1, %v145_v4 }
  0x39   : > { %957 = vmatmul.mubr.msk.f32.gmra.mrb[16].mxu0 %vm182_vm1, %v153_v20 }
  0x3a   : > { %1055 = vmatmul.mubr.msk.f32.vlgmr.msra.gmra.mrb[16].mxu1 %vm182_vm1, %v146_v6  ;;  %404 = vmatprep.mubr.f32.mxu0 %v1213_v2 }
  0x3b   : > { %1057 = vmatprep.mubr.msk.f32.mxu1 %vm182_vm1, %v147_v8 }
  0x3d   : > { %958 = vmatmul.mubr.msk.f32.gmra.mrb[18].mxu0 %vm182_vm1, %v154_v21 }
  0x3e   : > { %1058 = vmatmul.mubr.msk.f32.gmra.mrb[18].mxu1 %vm182_vm1, %v148_v10  ;;  %410 = vmatprep.mubr.f32.mxu0 %v1213_v2 }
  0x3f   : > { %1060 = vmatprep.mubr.msk.f32.mxu1 %vm182_vm1, %v149_v12 }
  0x41   : > { %959 = vmatmul.mubr.msk.f32.gmra.mrb[20].mxu0 %vm182_vm1, %v155_v22 }
  0x42   : > { %1061 = vmatmul.mubr.msk.f32.gmra.mrb[20].mxu1 %vm182_vm1, %v150_v14  ;;  %416 = vmatprep.mubr.f32.mxu0 %v1213_v2 }
  0x43   : > { %1063 = vmatprep.mubr.msk.f32.mxu1 %vm182_vm1, %v151_v16 }
  0x45   : > { %960 = vmatmul.mubr.msk.f32.gmra.mrb[22].mxu0 %vm182_vm1, %v156_v23 }
  0x46   : > { %1064 = vmatmul.mubr.msk.f32.gmra.mrb[22].mxu1 %vm182_vm1, %v152_v18  ;;  %422 = vmatprep.mubr.f32.mxu0 %v1213_v2 }
  0x47   : > { %1066 = vmatprep.mubr.msk.f32.mxu1 %vm182_vm1, %v153_v20 }
  0x49   : > { %961 = vmatmul.mubr.msk.f32.gmra.mrb[24].mxu0 %vm182_vm1, %v157_v24 }
  0x4a   : > { %1067 = vmatmul.mubr.msk.f32.gmra.mrb[24].mxu1 %vm182_vm1, %v154_v21  ;;  %428 = vmatprep.mubr.f32.mxu0 %v1213_v2 }
  0x4b   : > { %1069 = vmatprep.mubr.msk.f32.mxu1 %vm182_vm1, %v155_v22 }
  0x4d   : > { %962 = vmatmul.mubr.msk.f32.gmra.mrb[26].mxu0 %vm182_vm1, %v158_v25 }
  0x4e   : > { %1070 = vmatmul.mubr.msk.f32.gmra.mrb[26].mxu1 %vm182_vm1, %v156_v23  ;;  %434 = vmatprep.mubr.f32.mxu0 %v1213_v2 }
  0x4f   : > { %1072 = vmatprep.mubr.msk.f32.mxu1 %vm182_vm1, %v157_v24 }
  0x51   : > { %963 = vmatmul.mubr.msk.f32.gmra.mrb[28].mxu0 %vm182_vm1, %v159_v26 }
  0x52   : > { %1073 = vmatmul.mubr.msk.f32.gmra.mrb[28].mxu1 %vm182_vm1, %v158_v25  ;;  %440 = vmatprep.mubr.f32.mxu0 %v1213_v2 }
  0x53   : > { %1075 = vmatprep.mubr.msk.f32.mxu1 %vm182_vm1, %v159_v26 }
  0x55   : > { %964 = vmatmul.mubr.msk.f32.gmra.mrb[30].mxu0 %vm182_vm1, %v160_v27 }
  0x56   : > { %1076 = vmatmul.mubr.msk.f32.gmra.mrb[30].mxu1 %vm182_vm1, %v160_v27  ;;  %446 = vmatprep.mubr.f32.mxu0 %v1213_v2 }
  0x57   : > { %1078 = vmatprep.mubr.msk.f32.mxu1 %vm182_vm1, %v161_v28 }
  0x59   : > { %965 = vmatmul.mubr.msk.f32.gmra.mrb[32].mxu0 %vm182_vm1, %v161_v28 }
  0x5a   : > { %1079 = vmatmul.mubr.msk.f32.gmra.mrb[32].mxu1 %vm182_vm1, %v162_v29  ;;  %452 = vmatprep.mubr.f32.mxu0 %v1213_v2 }
  0x5b   : > { %1081 = vmatprep.mubr.msk.f32.mxu1 %vm182_vm1, %v163_v30 }
  0x5d   : > { %966 = vmatmul.mubr.msk.f32.gmra.mrb[34].mxu0 %vm182_vm1, %v162_v29 }
  0x5e   : > { %1082 = vmatmul.mubr.msk.f32.gmra.mrb[34].mxu1 %vm182_vm1, %v164_v31  ;;  %458 = vmatprep.mubr.f32.mxu0 %v1213_v2 }
  0x5f   : > { %1084 = vmatprep.mubr.msk.f32.mxu1 %vm182_vm1, %v165_v32 }
  0x61   : > { %967 = vmatmul.mubr.msk.f32.gmra.mrb[36].mxu0 %vm182_vm1, %v163_v30 }
  0x62   : > { %1085 = vmatmul.mubr.msk.f32.gmra.mrb[36].mxu1 %vm182_vm1, %v166_v33  ;;  %464 = vmatprep.mubr.f32.mxu0 %v1213_v2 }
  0x63   : > { %1087 = vmatprep.mubr.msk.f32.mxu1 %vm182_vm1, %v167_v34 }
  0x65   : > { %968 = vmatmul.mubr.msk.f32.gmra.mrb[38].mxu0 %vm182_vm1, %v164_v31 }
  0x66   : > { %1088 = vmatmul.mubr.msk.f32.gmra.mrb[38].mxu1 %vm182_vm1, %v168_v35  ;;  %470 = vmatprep.mubr.f32.mxu0 %v1213_v2 }
  0x67   : > { %1090 = vmatprep.mubr.msk.f32.mxu1 %vm182_vm1, %v1301_v5 }
  0x69   : > { %969 = vmatmul.mubr.msk.f32.gmra.mrb[40].mxu0 %vm182_vm1, %v165_v32 }
  0x6a   : > { %1091 = vmatmul.mubr.msk.f32.gmra.mrb[40].mxu1 %vm182_vm1, %v1310_v7  ;;  %476 = vmatprep.mubr.f32.mxu0 %v1213_v2 }
  0x6b   : > { %1093 = vmatprep.mubr.msk.f32.mxu1 %vm182_vm1, %v1320_v9 }
  0x6d   : > { %970 = vmatmul.mubr.msk.f32.gmra.mrb[42].mxu0 %vm182_vm1, %v166_v33 }
  0x6e   : > { %1094 = vmatmul.mubr.msk.f32.gmra.mrb[42].mxu1 %vm182_vm1, %v1329_v11  ;;  %482 = vmatprep.mubr.f32.mxu0 %v1213_v2 }
  0x6f   : > { %1096 = vmatprep.mubr.msk.f32.mxu1 %vm182_vm1, %v1338_v13 }
  0x71   : > { %971 = vmatmul.mubr.msk.f32.gmra.mrb[44].mxu0 %vm182_vm1, %v167_v34 }
  0x72   : > { %1097 = vmatmul.mubr.msk.f32.gmra.mrb[44].mxu1 %vm182_vm1, %v1347_v15  ;;  %488 = vmatprep.mubr.f32.mxu0 %v1213_v2 }
  0x73   : > { %1099 = vmatprep.mubr.msk.f32.mxu1 %vm182_vm1, %v1356_v17 }
  0x75   : > { %972 = vmatmul.mubr.msk.f32.gmra.mrb[46].mxu0 %vm182_vm1, %v168_v35 }
  0x76   : > { %1100 = vmatmul.mubr.msk.f32.gmra.mrb[46].mxu1 %vm182_vm1, %v1365_v19 }
  0xec   : > { %v352_v36 = vpop.f32.mrb[0].mxu0 }
  0xed   : > { %v496_v37 = vpop.f32.mrb[0].mxu1  ;;  %768 = vst [vmem:[%s1461_s4] sm:$0xff] %v352_v36  ;;  %v354_v38 = vpop.f32.mrb[1].mxu0 }
  0xee   : > { %840 = vst [vmem:[%s1461_s4 + $0x240] sm:$0xff] %v496_v37  ;;  %v498_v39 = vpop.f32.mrb[1].mxu1  ;;  %769 = vst [vmem:[%s1461_s4 + $0x8] sm:$0xff] %v354_v38 }
  0xef   : > { %841 = vst [vmem:[%s1461_s4 + $0x248] sm:$0xff] %v498_v39 }
  0xf0   : > { %v358_v40 = vpop.f32.mrb[2].mxu0 }
  0xf1   : > { %v502_v41 = vpop.f32.mrb[2].mxu1  ;;  %771 = vst [vmem:[%s1461_s4 + $0x18] sm:$0xff] %v358_v40  ;;  %v360_v42 = vpop.f32.mrb[3].mxu0 }
  0xf2   : > { %843 = vst [vmem:[%s1461_s4 + $0x258] sm:$0xff] %v502_v41  ;;  %v504_v43 = vpop.f32.mrb[3].mxu1  ;;  %772 = vst [vmem:[%s1461_s4 + $0x20] sm:$0xff] %v360_v42 }
  0xf3   : > { %844 = vst [vmem:[%s1461_s4 + $0x260] sm:$0xff] %v504_v43 }
  0xf4   : > { %v364_v44 = vpop.f32.mrb[4].mxu0 }
  0xf5   : > { %v508_v45 = vpop.f32.mrb[4].mxu1  ;;  %774 = vst [vmem:[%s1461_s4 + $0x30] sm:$0xff] %v364_v44  ;;  %v366_v46 = vpop.f32.mrb[5].mxu0 }
  0xf6   : > { %846 = vst [vmem:[%s1461_s4 + $0x270] sm:$0xff] %v508_v45  ;;  %v510_v47 = vpop.f32.mrb[5].mxu1  ;;  %775 = vst [vmem:[%s1461_s4 + $0x38] sm:$0xff] %v366_v46 }
  0xf7   : > { %847 = vst [vmem:[%s1461_s4 + $0x278] sm:$0xff] %v510_v47 }
  0xf8   : > { %v370_v48 = vpop.f32.mrb[6].mxu0 }
  0xf9   : > { %v514_v49 = vpop.f32.mrb[6].mxu1  ;;  %777 = vst [vmem:[%s1461_s4 + $0x48] sm:$0xff] %v370_v48  ;;  %v372_v50 = vpop.f32.mrb[7].mxu0 }
  0xfa   : > { %849 = vst [vmem:[%s1461_s4 + $0x288] sm:$0xff] %v514_v49  ;;  %v516_v51 = vpop.f32.mrb[7].mxu1  ;;  %778 = vst [vmem:[%s1461_s4 + $0x50] sm:$0xff] %v372_v50 }
  0xfb   : > { %850 = vst [vmem:[%s1461_s4 + $0x290] sm:$0xff] %v516_v51 }
  0xfc   : > { %v376_v52 = vpop.f32.mrb[8].mxu0 }
  0xfd   : > { %v520_v53 = vpop.f32.mrb[8].mxu1  ;;  %780 = vst [vmem:[%s1461_s4 + $0x60] sm:$0xff] %v376_v52  ;;  %v378_v54 = vpop.f32.mrb[9].mxu0 }
  0xfe   : > { %852 = vst [vmem:[%s1461_s4 + $0x2a0] sm:$0xff] %v520_v53  ;;  %v522_v55 = vpop.f32.mrb[9].mxu1  ;;  %781 = vst [vmem:[%s1461_s4 + $0x68] sm:$0xff] %v378_v54 }
  0xff   : > { %853 = vst [vmem:[%s1461_s4 + $0x2a8] sm:$0xff] %v522_v55 }
 0x100   : > { %v382_v56 = vpop.f32.mrb[10].mxu0 }
 0x101   : > { %v526_v57 = vpop.f32.mrb[10].mxu1  ;;  %783 = vst [vmem:[%s1461_s4 + $0x78] sm:$0xff] %v382_v56  ;;  %v384_v58 = vpop.f32.mrb[11].mxu0 }
 0x102   : > { %855 = vst [vmem:[%s1461_s4 + $0x2b8] sm:$0xff] %v526_v57  ;;  %v528_v59 = vpop.f32.mrb[11].mxu1  ;;  %784 = vst [vmem:[%s1461_s4 + $0x80] sm:$0xff] %v384_v58 }
 0x103   : > { %856 = vst [vmem:[%s1461_s4 + $0x2c0] sm:$0xff] %v528_v59 }
 0x104   : > { %v388_v60 = vpop.f32.mrb[12].mxu0 }
 0x105   : > { %v532_v61 = vpop.f32.mrb[12].mxu1  ;;  %786 = vst [vmem:[%s1461_s4 + $0x90] sm:$0xff] %v388_v60  ;;  %v390_v62 = vpop.f32.mrb[13].mxu0 }
 0x106   : > { %858 = vst [vmem:[%s1461_s4 + $0x2d0] sm:$0xff] %v532_v61  ;;  %v534_v63 = vpop.f32.mrb[13].mxu1  ;;  %787 = vst [vmem:[%s1461_s4 + $0x98] sm:$0xff] %v390_v62 }
 0x107   : > { %859 = vst [vmem:[%s1461_s4 + $0x2d8] sm:$0xff] %v534_v63 }
 0x108   : > { %v394_v0 = vpop.f32.mrb[14].mxu0 }
 0x109   : > { %v538_v1 = vpop.f32.mrb[14].mxu1  ;;  %789 = vst [vmem:[%s1461_s4 + $0xa8] sm:$0xff] %v394_v0  ;;  %v396_v2 = vpop.f32.mrb[15].mxu0 }
 0x10a   : > { %861 = vst [vmem:[%s1461_s4 + $0x2e8] sm:$0xff] %v538_v1  ;;  %v540_v3 = vpop.f32.mrb[15].mxu1  ;;  %790 = vst [vmem:[%s1461_s4 + $0xb0] sm:$0xff] %v396_v2 }
 0x10b   : > { %862 = vst [vmem:[%s1461_s4 + $0x2f0] sm:$0xff] %v540_v3 }
 0x10c   : > { %v400_v4 = vpop.f32.mrb[16].mxu0 }
 0x10d   : > { %v1056_v5 = vpop.f32.mrb[16].mxu1  ;;  %792 = vst [vmem:[%s1461_s4 + $0xc0] sm:$0xff] %v400_v4  ;;  %v402_v6 = vpop.f32.mrb[17].mxu0 }
 0x10e   : > { %773 = vst [vmem:[%s1461_s4 + $0x28] sm:$0xff] %v1056_v5  ;;  %v609_v7 = vpop.f32.mrb[17].mxu1  ;;  %793 = vst [vmem:[%s1461_s4 + $0xc8] sm:$0xff] %v402_v6 }
 0x10f   : > { %770 = vst [vmem:[%s1461_s4 + $0x10] sm:$0xff] %v609_v7 }
 0x110   : > { %v406_v8 = vpop.f32.mrb[18].mxu0 }
 0x111   : > { %v1059_v9 = vpop.f32.mrb[18].mxu1  ;;  %795 = vst [vmem:[%s1461_s4 + $0xd8] sm:$0xff] %v406_v8  ;;  %v408_v10 = vpop.f32.mrb[19].mxu0 }
 0x112   : > { %779 = vst [vmem:[%s1461_s4 + $0x58] sm:$0xff] %v1059_v9  ;;  %v619_v11 = vpop.f32.mrb[19].mxu1  ;;  %796 = vst [vmem:[%s1461_s4 + $0xe0] sm:$0xff] %v408_v10 }
 0x113   : > { %776 = vst [vmem:[%s1461_s4 + $0x40] sm:$0xff] %v619_v11 }
 0x114   : > { %v412_v12 = vpop.f32.mrb[20].mxu0 }
 0x115   : > { %v1062_v13 = vpop.f32.mrb[20].mxu1  ;;  %798 = vst [vmem:[%s1461_s4 + $0xf0] sm:$0xff] %v412_v12  ;;  %v414_v14 = vpop.f32.mrb[21].mxu0 }
 0x116   : > { %785 = vst [vmem:[%s1461_s4 + $0x88] sm:$0xff] %v1062_v13  ;;  %v629_v15 = vpop.f32.mrb[21].mxu1  ;;  %799 = vst [vmem:[%s1461_s4 + $0xf8] sm:$0xff] %v414_v14 }
 0x117   : > { %782 = vst [vmem:[%s1461_s4 + $0x70] sm:$0xff] %v629_v15 }
 0x118   : > { %v418_v16 = vpop.f32.mrb[22].mxu0 }
 0x119   : > { %v1065_v17 = vpop.f32.mrb[22].mxu1  ;;  %801 = vst [vmem:[%s1461_s4 + $0x108] sm:$0xff] %v418_v16  ;;  %v420_v18 = vpop.f32.mrb[23].mxu0 }
 0x11a   : > { %791 = vst [vmem:[%s1461_s4 + $0xb8] sm:$0xff] %v1065_v17  ;;  %v639_v19 = vpop.f32.mrb[23].mxu1  ;;  %802 = vst [vmem:[%s1461_s4 + $0x110] sm:$0xff] %v420_v18 }
 0x11b   : > { %788 = vst [vmem:[%s1461_s4 + $0xa0] sm:$0xff] %v639_v19 }
 0x11c   : > { %v424_v20 = vpop.f32.mrb[24].mxu0 }
 0x11d   : > { %v1068_v21 = vpop.f32.mrb[24].mxu1  ;;  %804 = vst [vmem:[%s1461_s4 + $0x120] sm:$0xff] %v424_v20  ;;  %v426_v22 = vpop.f32.mrb[25].mxu0 }
 0x11e   : > { %797 = vst [vmem:[%s1461_s4 + $0xe8] sm:$0xff] %v1068_v21  ;;  %v649_v23 = vpop.f32.mrb[25].mxu1  ;;  %805 = vst [vmem:[%s1461_s4 + $0x128] sm:$0xff] %v426_v22 }
 0x11f   : > { %794 = vst [vmem:[%s1461_s4 + $0xd0] sm:$0xff] %v649_v23 }
 0x120   : > { %v430_v24 = vpop.f32.mrb[26].mxu0 }
 0x121   : > { %v1071_v25 = vpop.f32.mrb[26].mxu1  ;;  %807 = vst [vmem:[%s1461_s4 + $0x138] sm:$0xff] %v430_v24  ;;  %v432_v26 = vpop.f32.mrb[27].mxu0 }
 0x122   : > { %803 = vst [vmem:[%s1461_s4 + $0x118] sm:$0xff] %v1071_v25  ;;  %v659_v27 = vpop.f32.mrb[27].mxu1  ;;  %808 = vst [vmem:[%s1461_s4 + $0x140] sm:$0xff] %v432_v26 }
 0x123   : > { %800 = vst [vmem:[%s1461_s4 + $0x100] sm:$0xff] %v659_v27 }
 0x124   : > { %v436_v28 = vpop.f32.mrb[28].mxu0 }
 0x125   : > { %v1074_v29 = vpop.f32.mrb[28].mxu1  ;;  %810 = vst [vmem:[%s1461_s4 + $0x150] sm:$0xff] %v436_v28  ;;  %v438_v30 = vpop.f32.mrb[29].mxu0 }
 0x126   : > { %809 = vst [vmem:[%s1461_s4 + $0x148] sm:$0xff] %v1074_v29  ;;  %v669_v31 = vpop.f32.mrb[29].mxu1  ;;  %811 = vst [vmem:[%s1461_s4 + $0x158] sm:$0xff] %v438_v30 }
 0x127   : > { %806 = vst [vmem:[%s1461_s4 + $0x130] sm:$0xff] %v669_v31 }
 0x128   : > { %v442_v32 = vpop.f32.mrb[30].mxu0 }
 0x129   : > { %v1077_v33 = vpop.f32.mrb[30].mxu1  ;;  %813 = vst [vmem:[%s1461_s4 + $0x168] sm:$0xff] %v442_v32  ;;  %v444_v34 = vpop.f32.mrb[31].mxu0 }
 0x12a   : > { %815 = vst [vmem:[%s1461_s4 + $0x178] sm:$0xff] %v1077_v33  ;;  %v679_v35 = vpop.f32.mrb[31].mxu1  ;;  %814 = vst [vmem:[%s1461_s4 + $0x170] sm:$0xff] %v444_v34 }
 0x12b   : > { %812 = vst [vmem:[%s1461_s4 + $0x160] sm:$0xff] %v679_v35 }
 0x12c   : > { %v448_v36 = vpop.f32.mrb[32].mxu0 }
 0x12d   : > { %v1080_v37 = vpop.f32.mrb[32].mxu1  ;;  %816 = vst [vmem:[%s1461_s4 + $0x180] sm:$0xff] %v448_v36  ;;  %v450_v38 = vpop.f32.mrb[33].mxu0 }
 0x12e   : > { %821 = vst [vmem:[%s1461_s4 + $0x1a8] sm:$0xff] %v1080_v37  ;;  %v689_v39 = vpop.f32.mrb[33].mxu1  ;;  %817 = vst [vmem:[%s1461_s4 + $0x188] sm:$0xff] %v450_v38 }
 0x12f   : > { %818 = vst [vmem:[%s1461_s4 + $0x190] sm:$0xff] %v689_v39 }
 0x130   : > { %v454_v40 = vpop.f32.mrb[34].mxu0 }
 0x131   : > { %v1083_v41 = vpop.f32.mrb[34].mxu1  ;;  %819 = vst [vmem:[%s1461_s4 + $0x198] sm:$0xff] %v454_v40  ;;  %v456_v42 = vpop.f32.mrb[35].mxu0 }
 0x132   : > { %827 = vst [vmem:[%s1461_s4 + $0x1d8] sm:$0xff] %v1083_v41  ;;  %v699_v43 = vpop.f32.mrb[35].mxu1  ;;  %820 = vst [vmem:[%s1461_s4 + $0x1a0] sm:$0xff] %v456_v42 }
 0x133   : > { %824 = vst [vmem:[%s1461_s4 + $0x1c0] sm:$0xff] %v699_v43 }
 0x134   : > { %v460_v44 = vpop.f32.mrb[36].mxu0 }
 0x135   : > { %v1086_v45 = vpop.f32.mrb[36].mxu1  ;;  %822 = vst [vmem:[%s1461_s4 + $0x1b0] sm:$0xff] %v460_v44  ;;  %v462_v46 = vpop.f32.mrb[37].mxu0 }
 0x136   : > { %833 = vst [vmem:[%s1461_s4 + $0x208] sm:$0xff] %v1086_v45  ;;  %v709_v47 = vpop.f32.mrb[37].mxu1  ;;  %823 = vst [vmem:[%s1461_s4 + $0x1b8] sm:$0xff] %v462_v46 }
 0x137   : > { %830 = vst [vmem:[%s1461_s4 + $0x1f0] sm:$0xff] %v709_v47 }
 0x138   : > { %v466_v48 = vpop.f32.mrb[38].mxu0 }
 0x139   : > { %v1089_v49 = vpop.f32.mrb[38].mxu1  ;;  %825 = vst [vmem:[%s1461_s4 + $0x1c8] sm:$0xff] %v466_v48  ;;  %v468_v50 = vpop.f32.mrb[39].mxu0 }
 0x13a   : > { %839 = vst [vmem:[%s1461_s4 + $0x238] sm:$0xff] %v1089_v49  ;;  %v719_v51 = vpop.f32.mrb[39].mxu1  ;;  %826 = vst [vmem:[%s1461_s4 + $0x1d0] sm:$0xff] %v468_v50 }
 0x13b   : > { %836 = vst [vmem:[%s1461_s4 + $0x220] sm:$0xff] %v719_v51 }
 0x13c   : > { %v472_v52 = vpop.f32.mrb[40].mxu0 }
 0x13d   : > { %v1092_v53 = vpop.f32.mrb[40].mxu1  ;;  %828 = vst [vmem:[%s1461_s4 + $0x1e0] sm:$0xff] %v472_v52  ;;  %v474_v54 = vpop.f32.mrb[41].mxu0 }
 0x13e   : > { %845 = vst [vmem:[%s1461_s4 + $0x268] sm:$0xff] %v1092_v53  ;;  %v729_v55 = vpop.f32.mrb[41].mxu1  ;;  %829 = vst [vmem:[%s1461_s4 + $0x1e8] sm:$0xff] %v474_v54 }
 0x13f   : > { %842 = vst [vmem:[%s1461_s4 + $0x250] sm:$0xff] %v729_v55 }
 0x140   : > { %v478_v56 = vpop.f32.mrb[42].mxu0 }
 0x141   : > { %v1095_v57 = vpop.f32.mrb[42].mxu1  ;;  %831 = vst [vmem:[%s1461_s4 + $0x1f8] sm:$0xff] %v478_v56  ;;  %v480_v58 = vpop.f32.mrb[43].mxu0 }
 0x142   : > { %851 = vst [vmem:[%s1461_s4 + $0x298] sm:$0xff] %v1095_v57  ;;  %v739_v59 = vpop.f32.mrb[43].mxu1  ;;  %832 = vst [vmem:[%s1461_s4 + $0x200] sm:$0xff] %v480_v58 }
 0x143   : > { %848 = vst [vmem:[%s1461_s4 + $0x280] sm:$0xff] %v739_v59 }
 0x144   : > { %v484_v60 = vpop.f32.mrb[44].mxu0 }
 0x145   : > { %v1098_v61 = vpop.f32.mrb[44].mxu1  ;;  %834 = vst [vmem:[%s1461_s4 + $0x210] sm:$0xff] %v484_v60  ;;  %v486_v62 = vpop.f32.mrb[45].mxu0 }
 0x146   : > { %857 = vst [vmem:[%s1461_s4 + $0x2c8] sm:$0xff] %v1098_v61  ;;  %v749_v63 = vpop.f32.mrb[45].mxu1  ;;  %835 = vst [vmem:[%s1461_s4 + $0x218] sm:$0xff] %v486_v62 }
 0x147   : > { %854 = vst [vmem:[%s1461_s4 + $0x2b0] sm:$0xff] %v749_v63 }
 0x148   : > { %v490_v0 = vpop.f32.mrb[46].mxu0 }
 0x149   : > { %v1101_v1 = vpop.f32.mrb[46].mxu1  ;;  %837 = vst [vmem:[%s1461_s4 + $0x228] sm:$0xff] %v490_v0  ;;  %v492_v2 = vpop.f32.mrb[47].mxu0 }
 0x14a   : > { %863 = vst [vmem:[%s1461_s4 + $0x2f8] sm:$0xff] %v1101_v1  ;;  %v759_v3 = vpop.f32.mrb[47].mxu1  ;;  %838 = vst [vmem:[%s1461_s4 + $0x230] sm:$0xff] %v492_v2 }
 0x14b   : > { %860 = vst [vmem:[%s1461_s4 + $0x2e0] sm:$0xff] %v759_v3 }
 0x14c   : > { %1162 = shalt.err (!%p1159_p3)
}
 0x14d   : > { %s1163_s23 = scalar_lea.hbm %s1560_s14, 12288  ;;  %s1167_s26 = scalar_lea.hbm %s1613_s2, 24576 }
 0x14e   : > { %p1164_p4 = scmp.ne.s32.totalorder %s1560_s14, %s1163_s23  ;;  %p1168_p9 = scmp.lt.u32.totalorder %s1560_s14, %s1613_s2 }
 0x14f   : > { %p1169_p10 = scmp.lt.u32.totalorder %s1167_s26, %s1163_s23  ;;  %p1171_p12 = scmp.lt.u32.totalorder %s1163_s23, %s1560_s14 }
 0x150   : > { %p1165_p7 = pnand %p1164_p4, %p1270_p5 }
 0x151   : > { %p1170_p11 = por %p1169_p10, %p1168_p9 }
 0x152   : > { %p1166_p8 = pneg %p1165_p7 }
 0x153   : > { %p1172_p13 = por %p1171_p12, %p1170_p11 }
 0x155   : > { %p1173_p0 = pnand %p1172_p13, %p1166_p8 }
 0x157   : > { %1176 = shalt.err (!%p1173_p0)
}
 0x158   : > { %s1215_s29 = smov 384   ;;  %s1216_s30 = smov 24  }
 0x159   : > { %1106 = dma.vmem_to_hbm [thread:$0]  (%p1270_p5), %s1562_s6, 12288, %s1560_s14, %s1570_s13, %s1215_s29, %s1215_s29, %s1216_s30  }
 0x15a PF: > { %p1112_p1 = scmp.ge.s32.totalorder %s1211_s12, 2  ;;  %s894_s3 = sand.u32 1, %s1199_s9  }
 0x15b   : > { %s895_s4 = scalar_lea.sflag [#allocation3], %s894_s3 }
 0x15c   : > { %p1109_p2 = pnand %p1112_p1, %p1274_p6 }
 0x15e   : > { %1194 = dma.done.wait (!%p1109_p2), %s895_s4, 12288  }
 0x15f   : > { %1196 = vsyncadd (!%p1109_p2), %s895_s4, 4294955008  ;;  %p12_p3 = scmp.ge.s32.totalorder %s1257_s15, 4   ;;  %s1616_s9 = smov %s1203_s10 }
 0x160   : > { %s1617_s10 = smov %s1207_s11  ;;  %s1618_s11 = smov %s1268_s18 }
 0x161   : > { %s1619_s12 = smov %s1257_s15  ;;  %14 = sbr.rel (!%p12_p3) target bundleno = 3 (0x3), region = 63 }
 0x168   :  { %900 = vsyncpa [#allocation3], 1 }
 0x169   :  { %902 = vsyncpa [#allocation3 + $0x1], 1 }

</bundles_post_ra>
